<compile_context>
chip_gen: v6e
topology: v6e:2x2x1
jax: 0.10.0
libtpu: 0.0.40
codegen_flags: <defaults>
</compile_context>

<pallas_src>
import functools

import jax
import jax.numpy as jnp
from jax import lax
from jax.experimental import pallas as pl
from jax.experimental.pallas import tpu as pltpu


def _cdiv(a, b):
    return -(-a // b)


def _round_up(a, b):
    return _cdiv(a, b) * b


def _num_tensorcores():
    """Best-effort TensorCores-per-chip (2 on v7x-class parts, else 1).

    Correctness does not depend on this value; it only controls how many
    batch chunks the "parallel" grid axis is split into.
    """
    try:
        info = pltpu.get_tpu_info()
        for name in ("num_tensorcores", "tensorcore_count", "num_cores", "core_count"):
            v = getattr(info, name, None)
            if isinstance(v, int) and 1 <= v <= 8:
                return v
    except Exception:
        pass
    try:
        kind = jax.devices()[0].device_kind.lower()
        if "v7" in kind:
            return 2
    except Exception:
        pass
    return 1


def _cluster_loss_kernel(x_ref, cw_ref, out_ref, acc_x_ref, acc_x2_ref, *,
                         d_dim, b_dim, fd, tb, tf, nb,
                         need_row_mask, need_col_mask):
    i = pl.program_id(0)      # batch chunk (one per TensorCore)
    f = pl.program_id(1)      # F*D lane tile
    j = pl.program_id(2)      # batch block within the chunk (reduction axis)
    nj = pl.num_programs(2)

    # Fresh accumulators at the start of every (chunk, lane-tile) reduction.
    @pl.when(j == 0)
    def _():
        acc_x_ref[...] = jnp.zeros_like(acc_x_ref)
        acc_x2_ref[...] = jnp.zeros_like(acc_x2_ref)

    row0 = (i * nb + j) * tb  # logical first row of this block (for masking)

    if tb % 8 == 0:
        # Main path: stream the block in 8-row groups so each x vreg is read
        # from VMEM exactly once and feeds both accumulators via a register
        # carry (no per-group scratch RMW, no per-step cross-lane reduce).
        n_groups = tb // 8
        row_iota = lax.broadcasted_iota(jnp.int32, (8, tf), 0)   # hoisted
        if need_col_mask:
            col_valid = (f * tf + lax.broadcasted_iota(jnp.int32, (8, tf), 1)) < fd

        def body(g, carry):
            ax, ax2 = carry
            off = pl.multiple_of(g * 8, 8)
            xg = x_ref[pl.ds(off, 8), :].astype(jnp.float32)
            if need_row_mask or need_col_mask:
                valid = None
                if need_row_mask:
                    valid = (row0 + off + row_iota) < b_dim
                if need_col_mask:
                    valid = col_valid if valid is None else jnp.logical_and(valid, col_valid)
                xg = jnp.where(valid, xg, 0.0)
            return ax + xg, ax2 + xg * xg

        zero = jnp.zeros((8, tf), jnp.float32)
        ax, ax2 = lax.fori_loop(0, n_groups, body, (zero, zero),
                                unroll=min(8, n_groups))
        acc_x_ref[...] += ax
        acc_x2_ref[...] += ax2
    else:
        # Tiny-batch path (B < 8): a single sub-8-row block covers the whole
        # batch, so no row mask is ever needed here; add straight into the
        # first tb sublanes of the accumulators (no per-step reduce).
        x = x_ref[...].astype(jnp.float32)                        # (tb, tf)
        if need_col_mask:
            cm = (f * tf + lax.broadcasted_iota(jnp.int32, (tb, tf), 1)) < fd
            x = jnp.where(cm, x, 0.0)
        acc_x_ref[pl.ds(0, tb), :] += x
        acc_x2_ref[pl.ds(0, tb), :] += x * x

    # Per-(chunk, lane-tile) epilogue: collapse sublanes/lanes exactly once.
    @pl.when(j == nj - 1)
    def _():
        cw = cw_ref[...]                                # (1, tf); zeros past fd
        coef = jnp.float32(d_dim - 2)
        sum_x2 = jnp.sum(acc_x2_ref[...])
        mixed = jnp.sum(acc_x_ref[...] * cw)
        out_ref[...] = (coef * sum_x2 + mixed).reshape(1, 1, 1)


_LANE_TILE_CAP = 1024             # keeps 2x(8,tf) f32 register carry small
_BLOCK_BYTES = 4 * 1024 * 1024    # ~4 MiB x blocks: >=85% of HBM roofline


def cluster_loss(stack_outputs, center, latent_domain_label=None, alpha=1.0):
    """Pallas implementation of ClusterLoss.forward.

    stack_outputs: (B, F, D); center: (F, D).
    latent_domain_label / alpha do not affect the returned value in the
    reference module (dead code), so they are ignored.
    """
    del latent_domain_label, alpha
    b_dim, f_dim, d_dim = stack_outputs.shape
    fd = f_dim * d_dim
    itemsize = jnp.dtype(stack_outputs.dtype).itemsize

    # Center-derived weight vector (tiny, wrapper side): 4*c - 2*rowsum(c).
    c32 = center.astype(jnp.float32)
    crow = jnp.sum(c32, axis=1, keepdims=True)                    # (F, 1)
    cw = (4.0 * c32 - 2.0 * crow).reshape(1, fd)                  # (1, F*D)

    # ---- lane (F*D) tiling: guard very large F*D against VMEM blowup -------
    if fd <= _LANE_TILE_CAP:
        nf, tf = 1, fd                        # full-dim block (no alignment needed)
    else:
        nf = _cdiv(fd, _LANE_TILE_CAP)
        tf = _round_up(_cdiv(fd, nf), 128)    # balanced, 128-lane aligned tiles
    need_col_mask = nf * tf != fd
    if need_col_mask:
        cw = jnp.pad(cw, ((0, 0), (0, nf * tf - fd)))   # tiny pad; zeros past fd

    # ---- batch tiling: byte-sized blocks, dtype-aware sublane rounding -----
    num_tc = _num_tensorcores()
    sub = max(8, 32 // itemsize)              # 8 f32 / 16 bf16 / 32 int8
    if b_dim < 8:
        tb = b_dim                            # block == full batch dim (allowed)
    else:
        rows_budget = max(sub, (_BLOCK_BYTES // (tf * itemsize)) // sub * sub)
        cap = (b_dim // sub) * sub
        if cap == 0:
            cap = (b_dim // 8) * 8            # 8 <= B < sub (packed dtypes)
        tb = min(rows_budget, cap)
        if num_tc > 1:
            # ensure every TensorCore gets at least one block of work
            tb = min(tb, _round_up(_cdiv(b_dim, num_tc), sub))
    nb_total = _cdiv(b_dim, tb)
    nc = max(1, min(num_tc, nb_total))        # one batch chunk per TensorCore
    nb = _cdiv(nb_total, nc)
    need_row_mask = nc * nb * tb > b_dim      # ragged tail masked in-kernel (no jnp.pad of x)

    # ---- explicit VMEM budget (v5e scoped default 16 MiB, v7x 64 MiB phys) --
    x_blk_bytes = tb * tf * itemsize
    vmem_need = 2 * x_blk_bytes + 2 * tf * 4 + 2 * 8 * tf * 4 + (1 << 20)
    vmem_limit = int(min(max(2 * vmem_need, 16 << 20), 30 << 20))

    x_flat = stack_outputs.reshape(b_dim, fd)   # contiguous reshape: no HBM copy

    kernel = functools.partial(
        _cluster_loss_kernel, d_dim=d_dim, b_dim=b_dim, fd=fd, tb=tb, tf=tf,
        nb=nb, need_row_mask=need_row_mask, need_col_mask=need_col_mask)

    last_blk = nb_total - 1
    partials = pl.pallas_call(
        kernel,
        out_shape=jax.ShapeDtypeStruct((nc * nf, 1, 1), jnp.float32),
        grid_spec=pltpu.PrefetchScalarGridSpec(
            num_scalar_prefetch=0,
            grid=(nc, nf, nb),
            in_specs=[
                # Clamp phantom trailing blocks; their rows are >= B and masked.
                pl.BlockSpec((tb, tf),
                             lambda i, f, j: (jnp.minimum(i * nb + j, last_blk), f)),
                pl.BlockSpec((1, tf), lambda i, f, j: (0, f)),
            ],
            out_specs=pl.BlockSpec((1, 1, 1), lambda i, f, j: (i * nf + f, 0, 0)),
            scratch_shapes=[
                pltpu.VMEM((8, tf), jnp.float32),   # sum_b x   (collapsed in epilogue)
                pltpu.VMEM((8, tf), jnp.float32),   # sum_b x^2 (collapsed in epilogue)
            ],
        ),
        compiler_params=pltpu.CompilerParams(
            dimension_semantics=("parallel", "arbitrary", "arbitrary"),
            vmem_limit_bytes=vmem_limit),
    )(x_flat, cw)

    # Center-only term + mean (center is tiny; negligible XLA-side work).
    sc_term = jnp.float32(b_dim * (d_dim - 2)) * jnp.sum(c32 * c32)
    return (jnp.sum(partials) + sc_term) / jnp.float32(b_dim * d_dim * d_dim)


def _cluster_loss_ref(stack_outputs, center):
    """Pure-JAX reference mirroring the PyTorch forward (direct differences)."""
    b_dim, f_dim, d_dim = stack_outputs.shape
    diff = stack_outputs[:, :, :, None] - center[None, :, None, :]   # (B,F,D,D)
    m = jnp.sum(diff ** 2.0, axis=1)                                 # (B,D,D)
    sig = (-2.0 * jnp.eye(d_dim, dtype=jnp.float32)
           + jnp.ones((d_dim, d_dim), jnp.float32))
    return jnp.mean(m * sig)


if __name__ == "__main__":
    key = jax.random.PRNGKey(0)
    k1, k2, k3, k4 = jax.random.split(key, 4)

    # Primary small case (shapes consistent with the module): B=2, F=32, D=8.
    B, F, D = 2, 32, 8
    x = jax.random.normal(k1, (B, F, D), dtype=jnp.float32)
    c = jax.random.normal(k2, (F, D), dtype=jnp.float32)
    lbl = jnp.zeros((B,), dtype=jnp.int32)     # unused, as in the PyTorch module

    loss = jax.block_until_ready(cluster_loss(x, c, lbl, alpha=1.0))
    ref = _cluster_loss_ref(x, c)
    assert jnp.allclose(loss, ref, rtol=1e-3, atol=1e-3), (loss, ref)

    # Second case exercising the optimized general path: ragged batch tail
    # masked in-kernel, 8-row streaming loop, F*D lane tiling + lane mask.
    B2, F2, D2 = 10, 150, 8
    x2 = jax.random.normal(k3, (B2, F2, D2), dtype=jnp.float32)
    c2 = jax.random.normal(k4, (F2, D2), dtype=jnp.float32)
    loss2 = jax.block_until_ready(cluster_loss(x2, c2, None, alpha=1.0))
    ref2 = _cluster_loss_ref(x2, c2)
    assert jnp.allclose(loss2, ref2, rtol=2e-3, atol=1e-2), (loss2, ref2)

    print("KERNEL_OK")
</pallas_src>

<mosaic_0001>
module attributes {stable_mosaic.version = 11 : i64} {
  func.func @_cluster_loss_kernel(%arg0: i32, %arg1: i32, %arg2: i32, %arg3: memref<2x256xf32, #tpu.memory_space<vmem>>, %arg4: memref<1x256xf32, #tpu.memory_space<vmem>>, %arg5: memref<1x1x1xf32, #tpu.memory_space<vmem>>, %arg6: memref<8x256xf32, #tpu.memory_space<vmem>>, %arg7: memref<8x256xf32, #tpu.memory_space<vmem>>) attributes {dimension_semantics = [#tpu.dimension_semantics<parallel>, #tpu.dimension_semantics<arbitrary>, #tpu.dimension_semantics<arbitrary>], iteration_bounds = array<i64: 1, 1, 1>, scalar_prefetch = 0 : i64, scratch_operands = 2 : i64, tpu.core_type = #tpu.core_type<tc>, window_params = [{transform_indices = @transform_0, window_bounds = array<i64: 2, 256>}, {transform_indices = @transform_1, window_bounds = array<i64: 1, 256>}, {transform_indices = @transform_2, window_bounds = array<i64: 1, 1, 1>}]} {
    %c0_i32 = arith.constant 0 : i32
    %0 = arith.cmpi eq, %arg2, %c0_i32 : i32
    %1 = arith.extui %0 : i1 to i32
    %c0_i32_0 = arith.constant 0 : i32
    %2 = arith.cmpi ne, %1, %c0_i32_0 : i32
    scf.if %2 {
      %cst = arith.constant 0.000000e+00 : f32
      %14 = vector.broadcast %cst : f32 to vector<8x256xf32>
      %c0_12 = arith.constant 0 : index
      %c0_13 = arith.constant 0 : index
      %15 = vector.load %arg6[%c0_12, %c0_13] : memref<8x256xf32, #tpu.memory_space<vmem>>, vector<8x256xf32>
      tpu.vector_store %arg6[%c0_12, %c0_13], %14 {strides = array<i32>} : memref<8x256xf32, #tpu.memory_space<vmem>>, vector<8x256xf32>,
      %cst_14 = arith.constant 0.000000e+00 : f32
      %16 = vector.broadcast %cst_14 : f32 to vector<8x256xf32>
      %c0_15 = arith.constant 0 : index
      %c0_16 = arith.constant 0 : index
      %17 = vector.load %arg7[%c0_15, %c0_16] : memref<8x256xf32, #tpu.memory_space<vmem>>, vector<8x256xf32>
      tpu.vector_store %arg7[%c0_15, %c0_16], %16 {strides = array<i32>} : memref<8x256xf32, #tpu.memory_space<vmem>>, vector<8x256xf32>,
    } else {
    }
    %c0 = arith.constant 0 : index
    %c0_1 = arith.constant 0 : index
    %3 = vector.load %arg3[%c0, %c0_1] : memref<2x256xf32, #tpu.memory_space<vmem>>, vector<2x256xf32>
    %c0_2 = arith.constant 0 : index
    %c0_3 = arith.constant 0 : index
    %4 = vector.load %arg6[%c0_2, %c0_3] : memref<8x256xf32, #tpu.memory_space<vmem>>, vector<2x256xf32>
    %5 = arith.addf %4, %3 : vector<2x256xf32>
    %c0_4 = arith.constant 0 : index
    %c0_5 = arith.constant 0 : index
    %6 = vector.load %arg6[%c0_4, %c0_5] : memref<8x256xf32, #tpu.memory_space<vmem>>, vector<2x256xf32>
    tpu.vector_store %arg6[%c0_4, %c0_5], %5 {strides = array<i32>} : memref<8x256xf32, #tpu.memory_space<vmem>>, vector<2x256xf32>,
    %c0_6 = arith.constant 0 : index
    %c0_7 = arith.constant 0 : index
    %7 = vector.load %arg7[%c0_6, %c0_7] : memref<8x256xf32, #tpu.memory_space<vmem>>, vector<2x256xf32>
    %8 = arith.mulf %3, %3 : vector<2x256xf32>
    %9 = arith.addf %7, %8 : vector<2x256xf32>
    %c0_8 = arith.constant 0 : index
    %c0_9 = arith.constant 0 : index
    %10 = vector.load %arg7[%c0_8, %c0_9] : memref<8x256xf32, #tpu.memory_space<vmem>>, vector<2x256xf32>
    tpu.vector_store %arg7[%c0_8, %c0_9], %9 {strides = array<i32>} : memref<8x256xf32, #tpu.memory_space<vmem>>, vector<2x256xf32>,
    %c0_i32_10 = arith.constant 0 : i32
    %11 = arith.cmpi eq, %arg2, %c0_i32_10 : i32
    %12 = arith.extui %11 : i1 to i32
    %c0_i32_11 = arith.constant 0 : i32
    %13 = arith.cmpi ne, %12, %c0_i32_11 : i32
    scf.if %13 {
      %c0_12 = arith.constant 0 : index
      %c0_13 = arith.constant 0 : index
      %14 = vector.load %arg4[%c0_12, %c0_13] : memref<1x256xf32, #tpu.memory_space<vmem>>, vector<1x256xf32>
      %c0_14 = arith.constant 0 : index
      %c0_15 = arith.constant 0 : index
      %15 = vector.load %arg7[%c0_14, %c0_15] : memref<8x256xf32, #tpu.memory_space<vmem>>, vector<8x256xf32>
      %16 = vector.shape_cast %15 : vector<8x256xf32> to vector<1x8x256xf32>
      %cst = arith.constant dense<0.000000e+00> : vector<1xf32>
      %17 = vector.multi_reduction <add>, %16, %cst [1, 2] : vector<1x8x256xf32> to vector<1xf32>
      %18 = vector.shape_cast %17 : vector<1xf32> to vector<1x1x1xf32>
      %19 = vector.extract %18[0, 0, 0] : f32 from vector<1x1x1xf32>
      %c0_16 = arith.constant 0 : index
      %c0_17 = arith.constant 0 : index
      %20 = vector.load %arg6[%c0_16, %c0_17] : memref<8x256xf32, #tpu.memory_space<vmem>>, vector<8x256xf32>
      %21 = vector.broadcast %14 : vector<1x256xf32> to vector<8x256xf32>
      %22 = arith.mulf %20, %21 : vector<8x256xf32>
      %23 = vector.shape_cast %22 : vector<8x256xf32> to vector<1x8x256xf32>
      %cst_18 = arith.constant dense<0.000000e+00> : vector<1xf32>
      %24 = vector.multi_reduction <add>, %23, %cst_18 [1, 2] : vector<1x8x256xf32> to vector<1xf32>
      %25 = vector.shape_cast %24 : vector<1xf32> to vector<1x1x1xf32>
      %26 = vector.extract %25[0, 0, 0] : f32 from vector<1x1x1xf32>
      %cst_19 = arith.constant 6.000000e+00 : f32
      %27 = arith.mulf %cst_19, %19 : f32
      %28 = arith.addf %27, %26 : f32
      %29 = vector.broadcast %28 : f32 to vector<1x1x1xf32>
      %c0_20 = arith.constant 0 : index
      %c0_21 = arith.constant 0 : index
      %c0_22 = arith.constant 0 : index
      %30 = vector.load %arg5[%c0_20, %c0_21, %c0_22] : memref<1x1x1xf32, #tpu.memory_space<vmem>>, vector<1x1x1xf32>
      tpu.vector_store %arg5[%c0_20, %c0_21, %c0_22], %29 {strides = array<i32>} : memref<1x1x1xf32, #tpu.memory_space<vmem>>, vector<1x1x1xf32>,
    } else {
    }
    return
  }
  func.func @transform_0(%arg0: i32, %arg1: i32, %arg2: i32) -> (i32, i32) {
    %c1_i32 = arith.constant 1 : i32
    %0 = arith.muli %arg0, %c1_i32 : i32
    %1 = arith.addi %0, %arg2 : i32
    %c0_i32 = arith.constant 0 : i32
    %2 = arith.minsi %1, %c0_i32 : i32
    %c0_i32_0 = arith.constant 0 : i32
    return %2, %arg1 : i32, i32
  }
  func.func @transform_1(%arg0: i32, %arg1: i32, %arg2: i32) -> (i32, i32) {
    %c0_i32 = arith.constant 0 : i32
    %c0_i32_0 = arith.constant 0 : i32
    return %c0_i32, %arg1 : i32, i32
  }
  func.func @transform_2(%arg0: i32, %arg1: i32, %arg2: i32) -> (i32, i32, i32) {
    %c1_i32 = arith.constant 1 : i32
    %0 = arith.muli %arg0, %c1_i32 : i32
    %1 = arith.addi %0, %arg1 : i32
    %c0_i32 = arith.constant 0 : i32
    %c0_i32_0 = arith.constant 0 : i32
    %c0_i32_1 = arith.constant 0 : i32
    return %1, %c0_i32, %c0_i32_0 : i32, i32, i32
  }
}

</mosaic_0001>

<bundles_post_ra>
// kernel: tpu_custom_call.1
= control target key start
LH: loop header
LB: loop body
LE: loop exit
PB: predicated region body
PF: predicated region fallthrough
CT: control target
= control target key end

     0   :  { %7 = vsyncpa [#allocation5], 0  ;;  %s261_s0 = inlined_call_operand.hbm [shape: f32[2,256], index: 0, kind: input, shape index: {}]   ;;  %s262_s1 = inlined_call_operand.hbm [shape: f32[1,256], index: 1, kind: input, shape index: {}]   ;;  %s263_s2 = inlined_call_operand.hbm [shape: f32[1,1,1], index: 2, kind: output, shape index: {}]  }
   0x1   :  { %8 = vsyncpa [#allocation8], 0 }
   0x2   :  { %9 = vsyncpa [#allocation6], 0  ;;  %s232_s9 = smov [#allocation4]   ;;  %s233_s11 = smov [#allocation7]  }
   0x3   :  { %s22_s10 = sshll.u32 %s232_s9, 4  ;;  %s32_s12 = sshll.u32 %s233_s11, 4  ;;  %s23_s10 = int_to_ptr.vmem [resolvable:$true] %s22_s10  ;;  %s33_s12 = int_to_ptr.vmem [resolvable:$true] %s32_s12 }
   0x4   :  { %s174_s13 = scalar_lea.vmem %s23_s10, 64  ;;  %p179_p1 = scmp.lt.s32.totalorder %s23_s10, %s23_s10 }
   0x5   :  { %p175_p0 = scmp.ne.s32.totalorder %s23_s10, %s174_s13  ;;  %p180_p2 = scmp.lt.s32.totalorder %s174_s13, %s174_s13 }
   0x7   :  { %p181_p3 = por %p180_p2, %p179_p1 }
   0x9   :  { %p182_p4 = pnand %p181_p3, %p175_p0 }
   0xb   :  { %185 = shalt.err (!%p182_p4)
}
   0xc   :  { %25 = dma.hbm_to_vmem [thread:$0]  %s261_s0, 64, %s23_s10, [#allocation5]  }
   0xd   :  { %s194_s16 = scalar_lea.vmem %s33_s12, 32  ;;  %p199_p6 = scmp.lt.s32.totalorder %s33_s12, %s33_s12 }
   0xe   :  { %p195_p5 = scmp.ne.s32.totalorder %s33_s12, %s194_s16  ;;  %p200_p7 = scmp.lt.s32.totalorder %s194_s16, %s194_s16 }
  0x10   :  { %p201_p8 = por %p200_p7, %p199_p6 }
  0x12   :  { %p202_p9 = pnand %p201_p8, %p195_p5 }
  0x14   :  { %205 = shalt.err (!%p202_p9)
}
  0x15   :  { %35 = dma.hbm_to_vmem [thread:$0]  %s262_s1, 32, %s33_s12, [#allocation8]  }
  0x16   :  { %226 = dma.done.wait [#allocation5], 64  }
  0x17   :  { %227 = vsyncadd [#allocation5], 4294967232 }
  0x18   :  { %228 = dma.done.wait [#allocation8], 32  }
  0x19   :  { %229 = vsyncadd [#allocation8], 4294967264  ;;  %v61_v0 = vlaneseq  ;;  %v234_v1 = vmov 0.0   ;;  %v235_v2 = vmov 1983009808   ;;  %s236_s19 = smov [#allocation9]  }
  0x1a   :  { %52 = vst [vmem:[#allocation3 + $0x8] sm:$0xff] %v234_v1  ;;  %53 = vst [vmem:[#allocation3] sm:$0xff] %v234_v1  ;;  %v59_v3 = vunpack.c.l.s4 %v235_v2  ;;  %v54_v7 = vld [vmem:[#allocation4] sm:$0xf]  ;;  %v93_v23 = vld [vmem:[#allocation7] sm:$0x3] }
  0x1b   :  { %50 = vst [vmem:[#allocation2] sm:$0xff] %v234_v1  ;;  %51 = vst [vmem:[#allocation2 + $0x8] sm:$0xff] %v234_v1  ;;  %v62_v4 = vshrl.u32 %v61_v0, 7  ;;  %v74_v8 = vmul.f32 %v54_v7, %v54_v7  ;;  %s145_s20 = sshll.u32 %s236_s19, 4  ;;  %vm134_vm0 = vcmask 0   ;;  %s146_s20 = int_to_ptr.vmem [resolvable:$true] %s145_s20 }
  0x1c   :  { %v60_v5 = vunpack.c.0.s8 %v59_v3  ;;  %s206_s23 = scalar_lea.vmem %s146_s20, 16  ;;  %s210_s24 = scalar_lea.vmem %s146_s20, 32 }
  0x1d   :  { %v111_v21 = vsub.s32 0, %v62_v4  ;;  %v115_v22 = vsub.s32 1, %v62_v4  ;;  %p207_p10 = scmp.ne.s32.totalorder %s146_s20, %s206_s23  ;;  %p211_p11 = scmp.lt.s32.totalorder %s146_s20, %s146_s20 }
  0x1e   :  { %v63_v6 = vsub.s32 %v60_v5, %v62_v4  ;;  %p212_p12 = scmp.lt.s32.totalorder %s210_s24, %s206_s23 }
  0x1f   :  { %v112_v24 = vrot.slane %v93_v23, %v111_v21  ;;  %v116_v25 = vrot.slane %v93_v23, %v115_v22 }
  0x20   :  { %v64_v10 = vrot.slane %v54_v7, %v63_v6  ;;  %v82_v13 = vrot.slane %v74_v8, %v63_v6  ;;  %p213_p13 = por %p212_p12, %p211_p11 }
  0x21   :  { %v72_v11 = vld [vmem:[#allocation3 + $0x8] sm:$0x3]  ;;  %v73_v16 = vld [vmem:[#allocation3] sm:$0x3] }
  0x22   :  { %v55_v9 = vld [vmem:[#allocation2] sm:$0x3]  ;;  %v56_v12 = vld [vmem:[#allocation2 + $0x8] sm:$0x3]  ;;  %v65_v14 = vcombine.high %v64_v10, %v64_v10  ;;  %v83_v17 = vcombine.high %v82_v13, %v82_v13  ;;  %v86_v18 = vadd.f32 %v82_v13, %v72_v11  ;;  %p214_p0 = pnand %p213_p13, %p207_p10 }
  0x23   :  { %v68_v15 = vadd.f32 %v64_v10, %v55_v9 }
  0x24   :  { %v69_v19 = vadd.f32 %v65_v14, %v56_v12  ;;  %v87_v20 = vadd.f32 %v83_v17, %v73_v16  ;;  %88 = vst [vmem:[#allocation3 + $0x8] sm:$0x3] %v86_v18 }
  0x25   :  { %70 = vst [vmem:[#allocation2] sm:$0x3] %v68_v15 }
  0x26   :  { %71 = vst [vmem:[#allocation2 + $0x8] sm:$0x3] %v69_v19  ;;  %89 = vst [vmem:[#allocation3] sm:$0x3] %v87_v20 }
  0x2b   :  { %v94_v27 = vld [vmem:[#allocation3 + $0x8] sm:$0xff] }
  0x2c   :  { %v106_v26 = vld [vmem:[#allocation2] sm:$0xff] }
  0x2d   :  { %v107_v28 = vld [vmem:[#allocation2 + $0x8] sm:$0xff]  ;;  %v119_v29 = vmul.f32 %v112_v24, %v106_v26  ;;  %v95_v31 = vld [vmem:[#allocation3] sm:$0xff] }
  0x2e   :  { %v120_v30 = vmul.f32 %v116_v25, %v107_v28  ;;  %v96_v32 = vadd.f32 %v95_v31, %v94_v27 }
  0x30   :  { %97 = vadd.xlane.f32.xlu0 %v96_v32  ;;  %v121_v33 = vadd.f32 %v120_v30, %v119_v29 }
  0x34   :  { %122 = vadd.xlane.f32.xlu0 %v121_v33 }
  0xb9   :  { %v98_v34 = vpop.xlane.xlu0 %97 }
  0xba   :  { %v99_v35 = vrot.slane %v98_v34, 4 }
  0xbc   :  { %v100_v36 = vadd.f32 %v99_v35, %v98_v34 }
  0xbd   :  { %v123_v37 = vpop.xlane.xlu0 %122 }
  0xbe   :  { %v101_v38 = vrot.slane %v100_v36, 2  ;;  %v124_v39 = vrot.slane %v123_v37, 4 }
  0xc0   :  { %v125_v40 = vadd.f32 %v124_v39, %v123_v37  ;;  %v102_v41 = vadd.f32 %v101_v38, %v100_v36 }
  0xc2   :  { %v126_v42 = vrot.slane %v125_v40, 2  ;;  %v103_v43 = vrot.slane %v102_v41, 1 }
  0xc4   :  { %v127_v44 = vadd.f32 %v126_v42, %v125_v40  ;;  %v104_v45 = vadd.f32 %v103_v43, %v102_v41 }
  0xc6   :  { %157 = vpush %v104_v45  ;;  %v128_v46 = vrot.slane %v127_v44, 1 }
  0xc8   :  { %v129_v47 = vadd.f32 %v128_v46, %v127_v44 }
  0xca   :  { %159 = vpush %v129_v47 }
  0xf7   :  { %s158_s0 = spop %157 }
  0xf8   :  { %s131_s1 = smul.f32 6.0, %s158_s0 }
  0xfb   :  { %s160_s21 = spop %159 }
  0xfc   :  { %s132_s22 = sadd.f32 %s160_s21, %s131_s1 }
  0xfe   :  { %v133_v48 = vstv %s132_s22 }
  0xff   :  { %135 = vst.msk [vmem:[#allocation9] sm:$0x1] %vm134_vm0, %v133_v48 }
 0x100   :  { %217 = shalt.err (!%p214_p0)
}
 0x101   :  { %148 = dma.vmem_to_hbm [thread:$0]  %s146_s20, 16, %s263_s2, [#allocation6]  }
 0x102   :  { %230 = dma.done.wait [#allocation6], 16  }
 0x103   :  { %231 = vsyncadd [#allocation6], 4294967280 }
 0x104   :  { %152 = vsyncpa [#allocation5], 1 }
 0x105   :  { %153 = vsyncpa [#allocation8], 1 }
 0x106   :  { %154 = vsyncpa [#allocation6], 1 }

</bundles_post_ra>
